<compile_context>
chip_gen: v6e
topology: v6e:2x2x1
jax: 0.10.0
libtpu: 0.0.40
codegen_flags: <defaults>
</compile_context>

<pallas_src>
import jax
import jax.numpy as jnp
import numpy as np
from jax.experimental import pallas as pl
from jax.experimental.pallas import tpu as pltpu


def _ca_kernel(x_ref, w1t_ref, b1_ref, w2t_ref, b2_ref, o_ref):
    # x_ref: (Bb, C, HW); w1t: (C, hid); b1: (1, hid); w2t: (hid, C); b2: (1, C)
    Bb, C, HW = x_ref.shape
    x = x_ref[...]                                           # native dtype slab

    # Global average / max pool over the flattened spatial axis (f32 accumulation).
    avg = jnp.mean(x, axis=-1, dtype=jnp.float32)            # (Bb, C)
    mx = jnp.max(x, axis=-1).astype(jnp.float32)             # (Bb, C)

    # Folded bottleneck: run avg and max for all images through ONE matmul chain.
    v = jnp.concatenate([avg, mx], axis=0)                   # (2*Bb, C)
    w1t = w1t_ref[...].astype(jnp.float32)                   # (C, hid)
    w2t = w2t_ref[...].astype(jnp.float32)                   # (hid, C)
    h = jnp.dot(v, w1t, preferred_element_type=jnp.float32) + b1_ref[...]
    h = jnp.maximum(h, 0.0)                                  # (2*Bb, hid)
    p = jnp.dot(h, w2t, preferred_element_type=jnp.float32) + b2_ref[...]  # (2*Bb, C)

    pre = p[:Bb, :] + p[Bb:, :]                              # (Bb, C)
    y = jax.nn.sigmoid(pre)                                  # (Bb, C)

    # "repeat" over H, W: broadcast the attention map across the lane (HW) axis.
    o_ref[...] = jnp.broadcast_to(y[:, :, None], (Bb, C, HW)).astype(o_ref.dtype)


def channel_attention(x, w1, b1, w2, b2, *, vmem_budget_bytes=16 * 2**20):
    """x: (B, C, H, W); w1: (hid, C); b1: (hid,); w2: (C, hid); b2: (C,)."""
    B, C, H, W = x.shape
    hid = w1.shape[0]
    HW = H * W
    itemsize = x.dtype.itemsize

    x2 = x.reshape(B, C, HW)
    # Pre-transpose weights so the in-kernel matmuls need no in-kernel relayout.
    w1t = jnp.transpose(w1)                                  # (C, hid)
    w2t = jnp.transpose(w2)                                  # (hid, C)
    b1r = b1.reshape(1, hid)
    b2r = b2.reshape(1, C)

    # ---- choose batch block size Bb (VMEM-aware, keep >=2 grid steps when possible) ----
    slab = C * HW * itemsize                                 # one image, one buffer

    def fits(bb):                                            # in + out, double-buffered
        return 4 * bb * slab <= vmem_budget_bytes

    divisors = [d for d in range(1, B + 1) if B % d == 0 and fits(d)]
    if not divisors:
        bb = 1                                               # huge single-image slab; raise limit below
    else:
        pref = [d for d in divisors if B // d >= 2] if B >= 2 else divisors
        bb = max(pref) if pref else max(divisors)
    num_blocks = pl.cdiv(B, bb)

    weights_bytes = 2 * (C * hid + hid + C) * 4
    need = 4 * bb * slab + 2 * weights_bytes + (2 << 20)
    vmem_limit = int(min(max(need, 32 * 2**20), 100 * 2**20))

    cost = pl.CostEstimate(
        flops=int(2 * B * C * HW + 8 * B * C * hid),         # pools + folded bottleneck
        transcendentals=int(B * C),                          # sigmoid
        bytes_accessed=int(2 * B * C * HW * itemsize),       # read x, write map
    )

    out = pl.pallas_call(
        _ca_kernel,
        out_shape=jax.ShapeDtypeStruct((B, C, HW), x.dtype),
        grid_spec=pltpu.PrefetchScalarGridSpec(
            num_scalar_prefetch=0,
            grid=(num_blocks,),
            in_specs=[
                pl.BlockSpec((bb, C, HW), lambda i: (i, 0, 0)),   # x slab
                pl.BlockSpec((C, hid), lambda i: (0, 0)),         # W1^T (resident)
                pl.BlockSpec((1, hid), lambda i: (0, 0)),         # b1   (resident)
                pl.BlockSpec((hid, C), lambda i: (0, 0)),         # W2^T (resident)
                pl.BlockSpec((1, C), lambda i: (0, 0)),           # b2   (resident)
            ],
            out_specs=pl.BlockSpec((bb, C, HW), lambda i: (i, 0, 0)),
        ),
        compiler_params=pltpu.CompilerParams(
            dimension_semantics=("parallel",),
            vmem_limit_bytes=vmem_limit,
        ),
        cost_estimate=cost,
    )(x2, w1t, b1r, w2t, b2r)

    return out.reshape(B, C, H, W)


def channel_attention_ref(x, w1, b1, w2, b2):
    """Pure-JAX reference matching the PyTorch forward."""
    B, C, H, W = x.shape
    avg = jnp.mean(x, axis=(2, 3))                           # (B, C)
    mx = jnp.max(x, axis=(2, 3))                             # (B, C)
    fc = lambda v: jnp.maximum(v @ w1.T + b1, 0.0) @ w2.T + b2
    y = jax.nn.sigmoid(fc(avg) + fc(mx))                     # (B, C)
    return jnp.broadcast_to(y[:, :, None, None], (B, C, H, W))


if __name__ == "__main__":
    # Module config: n_channels_in=64, reduction_ratio=16 -> middle_layer_size=4.
    B, C, H, W = 2, 64, 16, 16
    reduction = 16
    hid = int(C / float(reduction))

    key = jax.random.PRNGKey(0)
    kx, k1, kb1, k2, kb2 = jax.random.split(key, 5)
    x = jax.random.normal(kx, (B, C, H, W), dtype=jnp.float32)
    # Deterministic Linear params (PyTorch Linear weight shapes: (out, in); biases present).
    bound1 = 1.0 / np.sqrt(C)
    bound2 = 1.0 / np.sqrt(hid)
    w1 = jax.random.uniform(k1, (hid, C), jnp.float32, -bound1, bound1)
    b1 = jax.random.uniform(kb1, (hid,), jnp.float32, -bound1, bound1)
    w2 = jax.random.uniform(k2, (C, hid), jnp.float32, -bound2, bound2)
    b2 = jax.random.uniform(kb2, (C,), jnp.float32, -bound2, bound2)

    out = channel_attention(x, w1, b1, w2, b2)
    out = jax.block_until_ready(out)

    ref = channel_attention_ref(x, w1, b1, w2, b2)
    np.testing.assert_allclose(np.asarray(out), np.asarray(ref), rtol=1e-5, atol=1e-5)
    print("KERNEL_OK")
</pallas_src>

<mosaic_0001>
module attributes {stable_mosaic.version = 11 : i64} {
  func.func @_ca_kernel(%arg0: i32, %arg1: memref<1x64x256xf32, #tpu.memory_space<vmem>>, %arg2: memref<64x4xf32, #tpu.memory_space<vmem>>, %arg3: memref<1x4xf32, #tpu.memory_space<vmem>>, %arg4: memref<4x64xf32, #tpu.memory_space<vmem>>, %arg5: memref<1x64xf32, #tpu.memory_space<vmem>>, %arg6: memref<1x64x256xf32, #tpu.memory_space<vmem>>) attributes {dimension_semantics = [#tpu.dimension_semantics<parallel>], iteration_bounds = array<i64: 2>, scalar_prefetch = 0 : i64, scratch_operands = 0 : i64, tpu.core_type = #tpu.core_type<tc>, window_params = [{transform_indices = @transform_0, window_bounds = array<i64: 1, 64, 256>}, {pipeline_mode = #tpu.pipeline_mode<synchronous>, transform_indices = @transform_1, window_bounds = array<i64: 64, 4>}, {pipeline_mode = #tpu.pipeline_mode<synchronous>, transform_indices = @transform_2, window_bounds = array<i64: 1, 4>}, {pipeline_mode = #tpu.pipeline_mode<synchronous>, transform_indices = @transform_3, window_bounds = array<i64: 4, 64>}, {pipeline_mode = #tpu.pipeline_mode<synchronous>, transform_indices = @transform_4, window_bounds = array<i64: 1, 64>}, {transform_indices = @transform_5, window_bounds = array<i64: 1, 64, 256>}]} {
    %c0 = arith.constant 0 : index
    %c0_0 = arith.constant 0 : index
    %c0_1 = arith.constant 0 : index
    %0 = vector.load %arg1[%c0, %c0_0, %c0_1] : memref<1x64x256xf32, #tpu.memory_space<vmem>>, vector<1x64x256xf32>
    %cst = arith.constant dense<0.000000e+00> : vector<1x64xf32>
    %1 = vector.multi_reduction <add>, %0, %cst [2] : vector<1x64x256xf32> to vector<1x64xf32>
    %cst_2 = arith.constant 2.560000e+02 : f32
    %2 = vector.broadcast %cst_2 : f32 to vector<1x64xf32>
    %3 = arith.divf %1, %2 : vector<1x64xf32>
    %cst_3 = arith.constant dense<0xFF800000> : vector<1x64xf32>
    %4 = vector.multi_reduction <maximumf>, %0, %cst_3 [2] : vector<1x64x256xf32> to vector<1x64xf32>
    %5 = tpu.concatenate %3, %4 in 0 : vector<1x64xf32>, vector<1x64xf32> -> vector<2x64xf32>
    %c0_4 = arith.constant 0 : index
    %c0_5 = arith.constant 0 : index
    %6 = vector.load %arg2[%c0_4, %c0_5] : memref<64x4xf32, #tpu.memory_space<vmem>>, vector<64x4xf32>
    %c0_6 = arith.constant 0 : index
    %c0_7 = arith.constant 0 : index
    %7 = vector.load %arg4[%c0_6, %c0_7] : memref<4x64xf32, #tpu.memory_space<vmem>>, vector<4x64xf32>
    %cst_8 = arith.constant dense<0.000000e+00> : vector<2x4xf32>
    %8 = tpu.matmul %5, %6, %cst_8 {dimension_numbers = #tpu.dot_dimension_numbers<[1], [0], [0], [1], [0, 0, 1, 1], [], []>} : vector<2x64xf32>, vector<64x4xf32>, vector<2x4xf32> -> vector<2x4xf32>
    %c0_9 = arith.constant 0 : index
    %c0_10 = arith.constant 0 : index
    %9 = vector.load %arg3[%c0_9, %c0_10] : memref<1x4xf32, #tpu.memory_space<vmem>>, vector<1x4xf32>
    %10 = vector.broadcast %9 : vector<1x4xf32> to vector<2x4xf32>
    %11 = arith.addf %8, %10 : vector<2x4xf32>
    %cst_11 = arith.constant 0.000000e+00 : f32
    %12 = vector.broadcast %cst_11 : f32 to vector<2x4xf32>
    %13 = arith.maximumf %11, %12 : vector<2x4xf32>
    %cst_12 = arith.constant dense<0.000000e+00> : vector<2x64xf32>
    %14 = tpu.matmul %13, %7, %cst_12 {dimension_numbers = #tpu.dot_dimension_numbers<[1], [0], [0], [1], [0, 0, 1, 1], [], []>} : vector<2x4xf32>, vector<4x64xf32>, vector<2x64xf32> -> vector<2x64xf32>
    %c0_13 = arith.constant 0 : index
    %c0_14 = arith.constant 0 : index
    %15 = vector.load %arg5[%c0_13, %c0_14] : memref<1x64xf32, #tpu.memory_space<vmem>>, vector<1x64xf32>
    %16 = vector.broadcast %15 : vector<1x64xf32> to vector<2x64xf32>
    %17 = arith.addf %14, %16 : vector<2x64xf32>
    %18 = vector.extract_strided_slice %17 {offsets = [0, 0], sizes = [1, 64], strides = [1, 1]} : vector<2x64xf32> to vector<1x64xf32>
    %19 = vector.extract_strided_slice %17 {offsets = [1, 0], sizes = [1, 64], strides = [1, 1]} : vector<2x64xf32> to vector<1x64xf32>
    %20 = arith.addf %18, %19 : vector<1x64xf32>
    %21 = arith.negf %20 : vector<1x64xf32>
    %22 = math.exp %21 : vector<1x64xf32>
    %cst_15 = arith.constant 1.000000e+00 : f32
    %23 = vector.broadcast %cst_15 : f32 to vector<1x64xf32>
    %24 = arith.addf %23, %22 : vector<1x64xf32>
    %25 = arith.divf %23, %24 : vector<1x64xf32>
    %26 = vector.shape_cast %25 : vector<1x64xf32> to vector<1x64x1xf32>
    %27 = vector.shape_cast %26 : vector<1x64x1xf32> to vector<1x64x1xf32>
    %28 = vector.broadcast %27 : vector<1x64x1xf32> to vector<1x64x256xf32>
    %c0_16 = arith.constant 0 : index
    %c0_17 = arith.constant 0 : index
    %c0_18 = arith.constant 0 : index
    %29 = vector.load %arg6[%c0_16, %c0_17, %c0_18] : memref<1x64x256xf32, #tpu.memory_space<vmem>>, vector<1x64x256xf32>
    tpu.vector_store %arg6[%c0_16, %c0_17, %c0_18], %28 {strides = array<i32>} : memref<1x64x256xf32, #tpu.memory_space<vmem>>, vector<1x64x256xf32>,
    return
  }
  func.func @transform_0(%arg0: i32) -> (i32, i32, i32) {
    %c0_i32 = arith.constant 0 : i32
    %c0_i32_0 = arith.constant 0 : i32
    %c0_i32_1 = arith.constant 0 : i32
    return %arg0, %c0_i32, %c0_i32_0 : i32, i32, i32
  }
  func.func @transform_1(%arg0: i32) -> (i32, i32) {
    %c0_i32 = arith.constant 0 : i32
    %c0_i32_0 = arith.constant 0 : i32
    %c0_i32_1 = arith.constant 0 : i32
    return %c0_i32, %c0_i32_0 : i32, i32
  }
  func.func @transform_2(%arg0: i32) -> (i32, i32) {
    %c0_i32 = arith.constant 0 : i32
    %c0_i32_0 = arith.constant 0 : i32
    %c0_i32_1 = arith.constant 0 : i32
    return %c0_i32, %c0_i32_0 : i32, i32
  }
  func.func @transform_3(%arg0: i32) -> (i32, i32) {
    %c0_i32 = arith.constant 0 : i32
    %c0_i32_0 = arith.constant 0 : i32
    %c0_i32_1 = arith.constant 0 : i32
    return %c0_i32, %c0_i32_0 : i32, i32
  }
  func.func @transform_4(%arg0: i32) -> (i32, i32) {
    %c0_i32 = arith.constant 0 : i32
    %c0_i32_0 = arith.constant 0 : i32
    %c0_i32_1 = arith.constant 0 : i32
    return %c0_i32, %c0_i32_0 : i32, i32
  }
  func.func @transform_5(%arg0: i32) -> (i32, i32, i32) {
    %c0_i32 = arith.constant 0 : i32
    %c0_i32_0 = arith.constant 0 : i32
    %c0_i32_1 = arith.constant 0 : i32
    return %arg0, %c0_i32, %c0_i32_0 : i32, i32, i32
  }
}

</mosaic_0001>

<bundles_post_ra>
// kernel: tpu_custom_call.1
= control target key start
LH: loop header
LB: loop body
LE: loop exit
PB: predicated region body
PF: predicated region fallthrough
CT: control target
= control target key end

     0   :  { %10 = vsyncpa [#allocation3], 0  ;;  %s1227_s0 = inlined_call_operand.hbm [shape: f32[2,64,256], index: 0, kind: input, shape index: {}]   ;;  %s1228_s1 = inlined_call_operand.vmem [shape: f32[64,4], index: 1, kind: input, shape index: {}]   ;;  %s1229_s2 = inlined_call_operand.vmem [shape: f32[1,4], index: 2, kind: input, shape index: {}]   ;;  %s1230_s3 = inlined_call_operand.vmem [shape: f32[4,64], index: 3, kind: input, shape index: {}]   ;;  %s1231_s4 = inlined_call_operand.vmem [shape: f32[1,64], index: 4, kind: input, shape index: {}]   ;;  %s1232_s5 = inlined_call_operand.hbm [shape: f32[2,64,256], index: 5, kind: output, shape index: {}]  }
   0x1   :  { %12 = vsyncpa [#allocation3 + $0x1], 0 }
   0x2   :  { %13 = vsyncpa [#allocation4], 0 }
   0x3   :  { %15 = vsyncpa [#allocation4 + $0x1], 0  ;;  %s999_s18 = smov 0   ;;  %s1001_s19 = smov 0  }
   0x4   :  { %s1003_s20 = smov 0   ;;  %s1005_s21 = smov 0  }
   0x5 LB: > { %s1020_s22 = sadd.s32 4294967295, %s959_s21   ;;  %s754_s23 = sadd.s32 4294967294, %s959_s21   ;;  %s959_s21 = sphi %s1005_s21, %s1247_s21   ;;  %s955_s20 = sphi %s1003_s20, %s1246_s20   ;;  %s951_s19 = sphi %s1001_s19, %s1245_s19   ;;  %s947_s18 = sphi %s999_s18, %s1244_s18  }
   0x6   : > { %s1024_s24 = sadd.s32 1, %s959_s21   ;;  %s28_s25 = sadd.s32 1, %s955_s20 }
   0x7   : > { %s25_s26 = ssub.s32 %s959_s21, %s1024_s24  ;;  %p35_p0 = scmp.ne.s32.totalorder %s955_s20, %s951_s19 }
   0x8   : > { %p26_p1 = scmp.eq.s32.totalorder %s25_s26, 0  ;;  %p36_p2 = scmp.eq.s32.totalorder %s959_s21, 0 }
   0x9   : > { %p41_p3 = scmp.ne.s32.totalorder %s951_s19, %s947_s18  ;;  %p42_p4 = scmp.eq.s32.totalorder %s1020_s22, 0 }
   0xa   : > { %s1036_s27 = scalar_select %p26_p1, %s955_s20, %s28_s25  }
   0xb   : > { %p1038_p5 = por %p36_p2, %p35_p0  ;;  %p1042_p6 = por %p42_p4, %p41_p3 }
   0xc   : > { %p149_p7 = scmp.eq.s32.totalorder %s1020_s22, 1  ;;  %p155_p8 = scmp.eq.s32.totalorder %s754_s23, 1 }
   0xd   : > { %s1236_s29 = scalar_select %p1042_p6, 1, 0 }
   0xe   : > { %p823_p10 = scmp.lt.s32.totalorder %s959_s21, 2  ;;  %p1049_p11 = por %p149_p7, %p35_p0 }
   0xf   : > { %p1053_p12 = por %p155_p8, %p41_p3  ;;  %s187_s7 = sand.u32 1, %s955_s20  }
  0x10   : > { %s1237_s30 = scalar_select %p1049_p11, 1, 0 }
  0x11   : > { %s1238_s6 = scalar_select %p1053_p12, 1, 0 }
  0x12   : > { %s774_s8 = sshll.u32 %s959_s21, 11  ;;  %s757_s9 = sshll.u32 %s187_s7, 7 }
  0x13   : > { %s1062_s12 = scalar_lea.hbm %s1227_s0, %s774_s8  ;;  %s191_s13 = scalar_lea.vmem [#allocation2], %s757_s9 }
  0x14   : > { %s198_s14 = sshll.u32 %s191_s13, 4  ;;  %p1066_p13 = pnand %p823_p10, %p1038_p5  ;;  %s1070_s14 = int_to_ptr.vmem [resolvable:$true] %s198_s14 }
  0x15   : > { %s1072_s16 = scalar_lea.sflag [#allocation3], %s187_s7  ;;  %s867_s17 = scalar_lea.hbm %s1062_s12, 2048 }
  0x16   : > { %p868_p0 = scmp.ne.s32.totalorder %s1062_s12, %s867_s17  ;;  %p869_p1 = pneg %p1066_p13 }
  0x17   : > { %s872_s26 = scalar_lea.hbm %s1227_s0, 4096  ;;  %p873_p4 = scmp.lt.s32.totalorder %s1062_s12, %s1227_s0 }
  0x18   : > { %p870_p2 = pnand %p869_p1, %p868_p0  ;;  %p874_p5 = scmp.lt.s32.totalorder %s872_s26, %s867_s17 }
  0x1a   : > { %p871_p3 = pneg %p870_p2  ;;  %p875_p7 = por %p874_p5, %p873_p4 }
  0x1c   : > { %p876_p8 = pnand %p875_p7, %p871_p3 }
  0x1e   : > { %879 = shalt.err (!%p876_p8)
}
  0x1f   : > { %s880_s7 = scalar_lea.vmem %s1070_s14, 2048  ;;  %s961_s9 = smov [#allocation2]  }
  0x20   : > { %p881_p10 = scmp.ne.s32.totalorder %s1070_s14, %s880_s7  ;;  %s885_s10 = sshll.u32 %s961_s9, 4  ;;  %s886_s10 = int_to_ptr.vmem [resolvable:$false] %s885_s10 }
  0x21   : > { %s887_s11 = scalar_lea.vmem %s886_s10, 4096  ;;  %p888_p2 = scmp.lt.s32.totalorder %s1070_s14, %s886_s10 }
  0x22   : > { %p883_p9 = pnand %p881_p10, %p869_p1  ;;  %p889_p12 = scmp.lt.s32.totalorder %s887_s11, %s880_s7 }
  0x24   : > { %p884_p0 = pneg %p883_p9  ;;  %p890_p11 = por %p889_p12, %p888_p2 }
  0x26   : > { %p891_p6 = pnand %p890_p11, %p884_p0 }
  0x28   : > { %894 = shalt.err (!%p891_p6)
}
  0x29   : > { %s962_s13 = smov 256   ;;  %s963_s17 = smov 16  }
  0x2a   : > { %818 = dma.hbm_to_vmem [thread:$0]  (!%p1066_p13), %s1062_s12, 2048, %s1070_s14, %s1072_s16, %s962_s13, %s962_s13, %s963_s17  }
  0x2b   : > { %p760_p9 = scmp.ge.s32.totalorder %s959_s21, 1  ;;  %p206_p1 = scmp.lt.s32.totalorder %s959_s21, 3 }
  0x2d   : > { %p207_p3 = pnand %p760_p9, %p206_p1 }
  0x2e   : > { %s1096_s23 = sand.u32 (!%p207_p3), 1, %s951_s19   ;;  %p1240_p6 = scmp.ne.s32.totalorder (!%p207_p3), %s1236_s29, 0 }
  0x2f   : > { %210 = sbr.rel (%p207_p3) target bundleno = 803 (0x323), region = 40  ;;  %s761_s25 = sshll.u32 (!%p207_p3), %s1096_s23, 7 }
  0x30   : > { %s213_s26 = scalar_lea.sflag (!%p207_p3), [#allocation3], %s1096_s23  ;;  %s1102_s28 = scalar_lea.vmem (!%p207_p3), [#allocation2], %s761_s25 }
  0x34   : > { %938 = dma.done.wait (%p1240_p6), %s213_s26, 2048  }
  0x35   : > { %940 = vsyncadd (%p1240_p6), %s213_s26, 4294965248  ;;  %v247_v0 = vld [vmem:[%s1102_s28 + $0x20] sm:$0xff]  ;;  %v248_v1 = vld [vmem:[%s1102_s28 + $0x28] sm:$0xff]  ;;  %v964_v32 = vmov 0.0   ;;  %vm965_vm0 = vmmov 0   ;;  %v324_v44 = vlaneseq  ;;  %vm335_vm1 = vcmask 130112  }
  0x36   : > { %v243_v2 = vld [vmem:[%s1102_s28] sm:$0xff]  ;;  %v265_v3 = vadd.f32 %v248_v1, %v247_v0  ;;  %v244_v4 = vld [vmem:[%s1102_s28 + $0x8] sm:$0xff]  ;;  %v249_v5 = vld [vmem:[%s1102_s28 + $0x30] sm:$0xff]  ;;  %v298_v16 = vmax.f32 %v247_v0, %v248_v1  ;;  %787 = vmatprep.subr.mxu0 %v964_v32  ;;  %806 = vmatprep.subr.mxu1 %v964_v32  ;;  %vm342_vm2 = vcmask 195712   ;;  %vm349_vm3 = vcmask 261312   ;;  %s242_s10 = scalar_lea.vmem [#allocation5], %s761_s25 }
  0x37   : > { %v250_v6 = vld [vmem:[%s1102_s28 + $0x38] sm:$0xff]  ;;  %v259_v7 = vadd.f32 %v244_v4, %v243_v2  ;;  %v245_v8 = vld [vmem:[%s1102_s28 + $0x10] sm:$0xff]  ;;  %v292_v13 = vmax.f32 %v243_v2, %v244_v4  ;;  %v251_v14 = vld [vmem:[%s1102_s28 + $0x40] sm:$0xff]  ;;  %803 = vmatprep.mubr.msk.f32.mxu0 %vm965_vm0, %v964_v32  ;;  %808 = vmatprep.mubr.msk.f32.mxu1 %vm965_vm0, %v964_v32  ;;  %v325_v47 = vand.u32 127, %v324_v44  ;;  %v1148_v51 = vshrl.u32 %v324_v44, 7  ;;  %s775_s25 = sshll.u32 %s1020_s22, 11 }
  0x38   : > { %v246_v9 = vld [vmem:[%s1102_s28 + $0x18] sm:$0xff]  ;;  %266 = vadd.xlane.f32.xlu1 %v265_v3  ;;  %v268_v10 = vadd.f32 %v250_v6, %v249_v5  ;;  %v252_v15 = vld [vmem:[%s1102_s28 + $0x48] sm:$0xff]  ;;  %v253_v18 = vld [vmem:[%s1102_s28 + $0x50] sm:$0xff]  ;;  %v301_v20 = vmax.f32 %v249_v5, %v250_v6  ;;  %vm356_vm4 = vcmask 326912   ;;  %vm363_vm5 = vcmask 392512   ;;  %s681_s11 = sshll.u32 %s242_s10, 4  ;;  %s1182_s26 = scalar_lea.hbm %s1232_s5, %s775_s25  ;;  %s1184_s11 = int_to_ptr.vmem [resolvable:$true] %s681_s11 }
  0x39   : > { %260 = vadd.xlane.f32.xlu0 %v259_v7  ;;  %v262_v11 = vadd.f32 %v246_v9, %v245_v8  ;;  %v295_v12 = vmax.f32 %v245_v8, %v246_v9  ;;  %v271_v17 = vadd.f32 %v252_v15, %v251_v14  ;;  %v254_v19 = vld [vmem:[%s1102_s28 + $0x58] sm:$0xff]  ;;  %v255_v22 = vld [vmem:[%s1102_s28 + $0x60] sm:$0xff]  ;;  %v256_v23 = vld [vmem:[%s1102_s28 + $0x68] sm:$0xff]  ;;  %v304_v24 = vmax.f32 %v251_v14, %v252_v15  ;;  %s895_s29 = scalar_lea.vmem %s1184_s11, 2048  ;;  %p1241_p12 = scmp.ne.s32.totalorder %s1237_s30, 0 }
  0x3a   : > { %v274_v21 = vadd.f32 %v254_v19, %v253_v18  ;;  %v277_v25 = vadd.f32 %v256_v23, %v255_v22  ;;  %v257_v26 = vld [vmem:[%s1102_s28 + $0x70] sm:$0xff]  ;;  %v258_v27 = vld [vmem:[%s1102_s28 + $0x78] sm:$0xff]  ;;  %v307_v28 = vmax.f32 %v253_v18, %v254_v19  ;;  %v310_v31 = vmax.f32 %v255_v22, %v256_v23  ;;  %v435_v35 = vld [vmem:[%s1228_s1 + $0x28] sm:$0xff]  ;;  %s668_s28 = scalar_lea.sflag [#allocation4], %s1096_s23  ;;  %p896_p11 = scmp.ne.s32.totalorder %s1184_s11, %s895_s29 }
  0x3b   : > { %v280_v29 = vadd.f32 %v258_v27, %v257_v26  ;;  %v313_v30 = vmax.f32 %v257_v26, %v258_v27  ;;  %v437_v33 = vld [vmem:[%s1228_s1 + $0x38] sm:$0xff]  ;;  %v436_v34 = vld [vmem:[%s1228_s1 + $0x30] sm:$0xff]  ;;  %v434_v36 = vld [vmem:[%s1228_s1 + $0x20] sm:$0xff]  ;;  %v330_v49 = vadd.s32 4294967288, %v325_v47  ;;  %v337_v55 = vadd.s32 4294967280, %v325_v47  ;;  %s966_s22 = smov [#allocation5]  }
  0x3c   : > { %269 = vadd.xlane.f32.xlu1 %v268_v10  ;;  %788 = vmatpush3.msra.mxu0 %v437_v33  ;;  %v433_v37 = vld [vmem:[%s1228_s1 + $0x18] sm:$0xff]  ;;  %v432_v38 = vld [vmem:[%s1228_s1 + $0x10] sm:$0xff]  ;;  %v431_v39 = vld [vmem:[%s1228_s1 + $0x8] sm:$0xff]  ;;  %v328_v57 = vsub.s32 %v325_v47, %v1148_v51  ;;  %v344_v59 = vadd.s32 4294967272, %v325_v47  ;;  %v351_v61 = vadd.s32 4294967264, %v325_v47  ;;  %v358_v62 = vadd.s32 4294967256, %v325_v47  ;;  %p897_p13 = pnand %p896_p11, %p1241_p12 }
  0x3d   : > { %263 = vadd.xlane.f32.xlu0 %v262_v11  ;;  %789 = vmatprep.subr.mxu0 %v964_v32  ;;  %v430_v40 = vld [vmem:[%s1228_s1] sm:$0xff]  ;;  %v333_v53 = vsub.s32 %v330_v49, %v1148_v51  ;;  %v340_v0 = vsub.s32 %v337_v55, %v1148_v51  ;;  %v365_v3 = vadd.s32 4294967248, %v325_v47  ;;  %v372_v8 = vadd.s32 4294967240, %v325_v47  ;;  %s899_s12 = sshll.u32 %s966_s22, 4  ;;  %s900_s12 = int_to_ptr.vmem [resolvable:$false] %s899_s12 }
  0x3e   : > { %790 = vmatpush3.msra.mxu0 %v436_v34  ;;  %v347_v5 = vsub.s32 %v344_v59, %v1148_v51  ;;  %v354_v9 = vsub.s32 %v351_v61, %v1148_v51  ;;  %v361_v11 = vsub.s32 %v358_v62, %v1148_v51  ;;  %vm370_vm6 = vcmask 458112   ;;  %p898_p4 = pneg %p897_p13  ;;  %s901_s14 = scalar_lea.vmem %s900_s12, 4096 }
  0x3f   : > { %791 = vmatprep.subr.mxu0 %v964_v32  ;;  %v368_v18 = vsub.s32 %v365_v3, %v1148_v51  ;;  %v375_v23 = vsub.s32 %v372_v8, %v1148_v51  ;;  %vm377_vm7 = vcmask 523712   ;;  %vm428_vm8 = vcmask 1040384   ;;  %p902_p5 = scmp.lt.s32.totalorder %s1184_s11, %s900_s12  ;;  %p903_p7 = scmp.lt.s32.totalorder %s901_s14, %s895_s29 }
  0x40   : > { %296 = vmax.xlane.f32.xlu1 %v295_v12  ;;  %792 = vmatpush3.msra.mxu0 %v435_v35  ;;  %vm446_vm9 = vcmask 523264   ;;  %vm532_vm10 = vcmask 1043456   ;;  %vm528_vm11 = vcmask 31744  }
  0x41   : > { %293 = vmax.xlane.f32.xlu0 %v292_v13  ;;  %793 = vmatprep.subr.mxu0 %v964_v32  ;;  %p904_p8 = por %p903_p7, %p902_p5 }
  0x42   : > { %794 = vmatpush3.msra.mxu0 %v434_v36 }
  0x43   : > { %795 = vmatprep.subr.mxu0 %v964_v32  ;;  %p905_p10 = pnand %p904_p8, %p898_p4 }
  0x44   : > { %299 = vmax.xlane.f32.xlu1 %v298_v16  ;;  %796 = vmatpush3.msra.mxu0 %v433_v37 }
  0x45   : > { %272 = vadd.xlane.f32.xlu0 %v271_v17  ;;  %797 = vmatprep.subr.mxu0 %v964_v32 }
  0x46   : > { %798 = vmatpush3.msra.mxu0 %v432_v38 }
  0x47   : > { %799 = vmatprep.subr.mxu0 %v964_v32 }
  0x48   : > { %302 = vmax.xlane.f32.xlu1 %v301_v20  ;;  %800 = vmatpush3.msra.mxu0 %v431_v39 }
  0x49   : > { %275 = vadd.xlane.f32.xlu0 %v274_v21  ;;  %801 = vmatprep.subr.mxu0 %v964_v32 }
  0x4a   : > { %802 = vmatpush3.msra.mxu0 %v430_v40 }
  0x4c   : > { %305 = vmax.xlane.f32.xlu1 %v304_v24 }
  0x4d   : > { %278 = vadd.xlane.f32.xlu0 %v277_v25 }
  0x50   : > { %308 = vmax.xlane.f32.xlu1 %v307_v28 }
  0x51   : > { %281 = vadd.xlane.f32.xlu0 %v280_v29 }
  0x54   : > { %314 = vmax.xlane.f32.xlu1 %v313_v30 }
  0x55   : > { %311 = vmax.xlane.f32.xlu0 %v310_v31 }
  0xc1   : > { %v267_v41 = vpop.xlane.xlu1 %266 }
  0xc2   : > { %v261_v42 = vpop.xlane.xlu0 %260  ;;  %v286_v1 = vmul.f32 0.00390625, %v267_v41 }
  0xc3   : > { %v284_v58 = vmul.f32 0.00390625, %v261_v42 }
  0xc4   : > { %v341_v16 = vrot.slane %v286_v1, %v340_v0 }
  0xc5   : > { %v270_v43 = vpop.xlane.xlu1 %269  ;;  %v329_v4 = vrot.slane %v284_v58, %v328_v57 }
  0xc6   : > { %v264_v45 = vpop.xlane.xlu0 %263  ;;  %v287_v6 = vmul.f32 0.00390625, %v270_v43 }
  0xc7   : > { %v285_v54 = vmul.f32 0.00390625, %v264_v45 }
  0xc8   : > { %v348_v21 = vrot.slane %v287_v6, %v347_v5 }
  0xc9   : > { %v297_v46 = vpop.xlane.xlu1 %296  ;;  %v334_v63 = vrot.slane %v285_v54, %v333_v53 }
  0xca   : > { %v294_v48 = vpop.xlane.xlu0 %293  ;;  %v395_v13 = vrot.slane %v297_v46, %v333_v53 }
  0xcb   : > { %v336_v12 = vsel %vm335_vm1, %v334_v63, %v329_v4  ;;  %v391_v14 = vrot.slane %v294_v48, %v328_v57  ;;  %v765_v57 = vld [vmem:[%s1231_s4] ss:$0 sm:$0xff] }
  0xcc   : > { %v343_v25 = vsel %vm342_vm2, %v341_v16, %v336_v12 }
  0xcd   : > { %v300_v50 = vpop.xlane.xlu1 %299  ;;  %v396_v29 = vsel %vm335_vm1, %v395_v13, %v391_v14  ;;  %v350_v35 = vsel %vm349_vm3, %v348_v21, %v343_v25 }
  0xce   : > { %v273_v52 = vpop.xlane.xlu0 %272  ;;  %v400_v17 = vrot.slane %v300_v50, %v340_v0  ;;  %v438_v50 = vld [vmem:[%s1230_s3] sm:$0xf] }
  0xcf   : > { %v288_v10 = vmul.f32 0.00390625, %v273_v52  ;;  %807 = vmatpush3.msk.msra.mxu1 %vm532_vm10, %v438_v50  ;;  %v763_v52 = vld [vmem:[%s1229_s2] ss:$0 sm:$0xff] }
  0xd0   : > { %v401_v32 = vsel %vm342_vm2, %v400_v17, %v396_v29 }
  0xd1   : > { %v303_v56 = vpop.xlane.xlu1 %302  ;;  %v355_v26 = vrot.slane %v288_v10, %v354_v9 }
  0xd2   : > { %v276_v60 = vpop.xlane.xlu0 %275  ;;  %v405_v22 = vrot.slane %v303_v56, %v347_v5 }
  0xd3   : > { %v289_v15 = vmul.f32 0.00390625, %v276_v60  ;;  %v357_v40 = vsel %vm356_vm4, %v355_v26, %v350_v35 }
  0xd4   : > { %v406_v36 = vsel %vm349_vm3, %v405_v22, %v401_v32 }
  0xd5   : > { %v306_v2 = vpop.xlane.xlu1 %305  ;;  %v362_v30 = vrot.slane %v289_v15, %v361_v11 }
  0xd6   : > { %v279_v7 = vpop.xlane.xlu0 %278  ;;  %v410_v27 = vrot.slane %v306_v2, %v354_v9  ;;  %v618_v2 = vsub.s32 0, %v1148_v51 }
  0xd7   : > { %v290_v19 = vmul.f32 0.00390625, %v279_v7  ;;  %v364_v43 = vsel %vm363_vm5, %v362_v30, %v357_v40 }
  0xd8   : > { %v411_v41 = vsel %vm356_vm4, %v410_v27, %v406_v36 }
  0xd9   : > { %v309_v20 = vpop.xlane.xlu1 %308  ;;  %v369_v33 = vrot.slane %v290_v19, %v368_v18 }
  0xda   : > { %v282_v24 = vpop.xlane.xlu0 %281  ;;  %v415_v31 = vrot.slane %v309_v20, %v361_v11 }
  0xdb   : > { %v291_v28 = vmul.f32 0.00390625, %v282_v24  ;;  %v371_v45 = vsel %vm370_vm6, %v369_v33, %v364_v43 }
  0xdc   : > { %v416_v44 = vsel %vm363_vm5, %v415_v31, %v411_v41 }
  0xdd   : > { %v315_v34 = vpop.xlane.xlu1 %314  ;;  %v376_v37 = vrot.slane %v291_v28, %v375_v23 }
  0xde   : > { %v312_v38 = vpop.xlane.xlu0 %311  ;;  %v425_v39 = vrot.slane %v315_v34, %v375_v23 }
  0xdf   : > { %v420_v42 = vrot.slane %v312_v38, %v368_v18  ;;  %v378_v48 = vsel %vm377_vm7, %v376_v37, %v371_v45 }
  0xe1   : > { %v421_v46 = vsel %vm370_vm6, %v420_v42, %v416_v44 }
  0xe2   : > { %v426_v47 = vsel %vm377_vm7, %v425_v39, %v421_v46 }
  0xe3   : > { %v429_v49 = vsel %vm428_vm8, %v378_v48, %v426_v47 }
  0xe4   : > { %804 = vmatmul.mubr.msk.f32.vlgmr.msra.gmra.mxu0 %vm446_vm9, %v429_v49 }
 0x1a4   : > { %v516_v53 = vpop.f32.mrf.mxu0 }
 0x1a5   : > { %v517_v54 = vadd.f32 %v763_v52, %v516_v53 }
 0x1a6   : > { %v805_v55 = vpop.f32.mrf.mxu0 }
 0x1a7   : > { %v520_v56 = vmax.f32 %v517_v54, 0.0 }
 0x1a9   : > { %809 = vmatmul.mubr.msk.f32.vlgmr.msra.gmra.mxu1 %vm528_vm11, %v520_v56 }
 0x269   : > { %v602_v58 = vpop.f32.mrf.mxu1 }
 0x26a   : > { %v603_v59 = vadd.f32 %v765_v57, %v602_v58 }
 0x26b   : > { %v810_v60 = vpop.f32.mrf.mxu1 }
 0x26c   : > { %v607_v61 = vrot.slane %v603_v59, 1 }
 0x26e   : > { %v609_v62 = vadd.f32 %v607_v61, %v603_v59 }
 0x270   : > { %v768_v63 = vmul.f32 -1.442695, %v609_v62 }
 0x272   : > { %863 = vpow2.f32 %v768_v63 }
 0x27f   : > { %v864_v0 = vpop.eup %863 }
 0x280   : > { %v613_v1 = vadd.f32 1.0, %v864_v0 }
 0x282   : > { %865 = vrcp.f32 %v613_v1 }
 0x28f   : > { %v866_v3 = vpop.eup %865 }
 0x290   : > { %v619_v4 = vrot.slane %v866_v3, %v618_v2 }
 0x292   : > { %625 = vbcast.lane.b32.xlu1 %v619_v4, 264  ;;  %621 = vbcast.lane.b32.xlu0 %v619_v4, 256 }
 0x296   : > { %629 = vbcast.lane.b32.xlu1 %v619_v4, 272  ;;  %637 = vbcast.lane.b32.xlu0 %v619_v4, 288 }
 0x29a   : > { %633 = vbcast.lane.b32.xlu1 %v619_v4, 280  ;;  %645 = vbcast.lane.b32.xlu0 %v619_v4, 304 }
 0x29e   : > { %641 = vbcast.lane.b32.xlu1 %v619_v4, 296 }
 0x2a2   : > { %649 = vbcast.lane.b32.xlu1 %v619_v4, 312 }
 0x304   : > { %v626_v5 = vpop.permute.xlu1 %625  ;;  %v622_v6 = vpop.permute.xlu0 %621 }
 0x305   : > { %653 = vst [vmem:[%s242_s10 + $0x10] sm:$0xff] %v626_v5  ;;  %654 = vst [vmem:[%s242_s10 + $0x18] sm:$0xff] %v626_v5 }
 0x306   : > { %651 = vst [vmem:[%s242_s10] sm:$0xff] %v622_v6  ;;  %652 = vst [vmem:[%s242_s10 + $0x8] sm:$0xff] %v622_v6 }
 0x308   : > { %v630_v51 = vpop.permute.xlu1 %629  ;;  %v638_v7 = vpop.permute.xlu0 %637 }
 0x309   : > { %655 = vst [vmem:[%s242_s10 + $0x20] sm:$0xff] %v630_v51  ;;  %656 = vst [vmem:[%s242_s10 + $0x28] sm:$0xff] %v630_v51 }
 0x30a   : > { %659 = vst [vmem:[%s242_s10 + $0x40] sm:$0xff] %v638_v7  ;;  %660 = vst [vmem:[%s242_s10 + $0x48] sm:$0xff] %v638_v7 }
 0x30c   : > { %v634_v8 = vpop.permute.xlu1 %633  ;;  %v646_v9 = vpop.permute.xlu0 %645 }
 0x30d   : > { %657 = vst [vmem:[%s242_s10 + $0x30] sm:$0xff] %v634_v8  ;;  %658 = vst [vmem:[%s242_s10 + $0x38] sm:$0xff] %v634_v8 }
 0x30e   : > { %663 = vst [vmem:[%s242_s10 + $0x60] sm:$0xff] %v646_v9  ;;  %664 = vst [vmem:[%s242_s10 + $0x68] sm:$0xff] %v646_v9 }
 0x310   : > { %v642_v10 = vpop.permute.xlu1 %641 }
 0x311   : > { %661 = vst [vmem:[%s242_s10 + $0x50] sm:$0xff] %v642_v10  ;;  %662 = vst [vmem:[%s242_s10 + $0x58] sm:$0xff] %v642_v10 }
 0x314   : > { %v650_v11 = vpop.permute.xlu1 %649 }
 0x315   : > { %665 = vst [vmem:[%s242_s10 + $0x70] sm:$0xff] %v650_v11  ;;  %666 = vst [vmem:[%s242_s10 + $0x78] sm:$0xff] %v650_v11 }
 0x316   : > { %908 = shalt.err (!%p905_p10)
}
 0x317   : > { %s909_s15 = scalar_lea.hbm %s1182_s26, 2048  ;;  %s913_s7 = scalar_lea.hbm %s1232_s5, 4096 }
 0x318   : > { %p910_p0 = scmp.ne.s32.totalorder %s1182_s26, %s909_s15  ;;  %p914_p1 = scmp.lt.s32.totalorder %s1182_s26, %s1232_s5 }
 0x319   : > { %p915_p3 = scmp.lt.s32.totalorder %s913_s7, %s909_s15 }
 0x31a   : > { %p911_p2 = pnand %p910_p0, %p1241_p12 }
 0x31b   : > { %p916_p6 = por %p915_p3, %p914_p1 }
 0x31c   : > { %p912_p9 = pneg %p911_p2 }
 0x31e   : > { %p917_p11 = pnand %p916_p6, %p912_p9 }
 0x320   : > { %920 = shalt.err (!%p917_p11)
}
 0x321   : > { %s967_s25 = smov 256   ;;  %s968_s13 = smov 16  }
 0x322   : > { %813 = dma.vmem_to_hbm [thread:$0]  (%p1241_p12), %s1184_s11, 2048, %s1182_s26, %s668_s28, %s967_s25, %s967_s25, %s968_s13  }
 0x323 PF: > { %s696_s17 = sand.u32 1, %s947_s18   ;;  %p1242_p13 = scmp.ne.s32.totalorder %s1238_s6, 0 }
 0x324   : > { %p1243_p4 = scmp.ge.s32.totalorder %s959_s21, 2  ;;  %s697_s29 = scalar_lea.sflag [#allocation4], %s696_s17 }
 0x326   : > { %p820_p5 = pnand %p1243_p4, %p1242_p13 }
 0x328   : > { %p821_p7 = pneg %p820_p5 }
 0x32a   : > { %942 = dma.done.wait (%p821_p7), %s697_s29, 2048  }
 0x32b   : > { %944 = vsyncadd (%p821_p7), %s697_s29, 4294965248  ;;  %p18_p8 = scmp.ge.s32.totalorder %s1024_s24, 4   ;;  %s1244_s18 = smov %s951_s19 }
 0x32c   : > { %s1245_s19 = smov %s955_s20  ;;  %s1246_s20 = smov %s1036_s27 }
 0x32d   : > { %s1247_s21 = smov %s1024_s24  ;;  %20 = sbr.rel (!%p18_p8) target bundleno = 5 (0x5), region = 85 }
 0x332   :  { %702 = vsyncpa [#allocation3], 1 }
 0x333   :  { %704 = vsyncpa [#allocation3 + $0x1], 1 }
 0x334   :  { %705 = vsyncpa [#allocation4], 1 }
 0x335   :  { %707 = vsyncpa [#allocation4 + $0x1], 1 }

</bundles_post_ra>
